<compile_context>
chip_gen: v7x
topology: tpu7x:2x2x1
jax: 0.10.0
libtpu: 0.0.40
codegen_flags: <defaults>
</compile_context>

<pallas_src>
import jax
import jax.numpy as jnp
from jax.experimental import pallas as pl
from jax.experimental.pallas import tpu as pltpu


_LANE = 128
_SUBLANE_BY_ITEMSIZE = {4: 8, 2: 16, 1: 32}  # f32 / bf16 / int8-fp8 sublane multiples


def _round_up(n: int, m: int) -> int:
    return ((n + m - 1) // m) * m


def _eltwise_kernel(x_ref, w_ref, o_ref):
    # x_ref: (tb, tf) input tile
    # w_ref: (1, tf)  weight tile (resident per feature chunk), broadcast over rows
    # o_ref: (tb, tf) output tile
    o_ref[...] = x_ref[...] * w_ref[...]


def trainable_eltwise(
    x: jax.Array,
    weights: jax.Array,
    *,
    target_block_bytes: int = 4 * 1024 * 1024,   # ~2-4 MiB per x block hits the HBM roofline
    vmem_limit_bytes: int = 48 * 1024 * 1024,    # safe on v5e/v6e (128 MiB) and v7x (64 MiB)
    donate_x: bool = False,
) -> jax.Array:
    """x: (B, size), weights: (1, size) -> (B, size) == x * weights."""
    B, size = x.shape
    assert weights.shape == (1, size), f"weights must be (1, {size}), got {weights.shape}"

    out_dtype = jnp.result_type(x.dtype, weights.dtype)
    x = x.astype(out_dtype)
    weights = weights.astype(out_dtype)

    itemsize = jnp.dtype(out_dtype).itemsize
    sub = _SUBLANE_BY_ITEMSIZE.get(itemsize, 8)

    # ---- Feature (lane) tiling: lane-dense, multiples of 128 -------------------------
    size_p = _round_up(size, _LANE)
    if size_p * sub * itemsize <= target_block_bytes:
        tf = size_p                                    # full feature width in one block
    else:
        tf = max(_LANE, (target_block_bytes // (sub * itemsize)) // _LANE * _LANE)
        tf = min(tf, size_p)
    size_pad = _round_up(size_p, tf)                   # make the feature grid exact

    # ---- Batch (sublane) tiling: dtype-aware multiple, ~target_block_bytes per block -
    tb = max(sub, (target_block_bytes // (tf * itemsize)) // sub * sub)
    B_p = _round_up(B, sub)
    tb = min(tb, B_p)
    # Keep >=2 grid steps along batch when possible (v7x has 2 TCs; also overlaps DMA).
    if B_p >= 2 * sub and B_p // tb < 2:
        tb = max(sub, _round_up((B_p + 1) // 2, sub))
    B_pad = _round_up(B_p, tb)

    # ---- Wrapper-side zero padding only for ragged shapes ----------------------------
    needs_pad = (B_pad != B) or (size_pad != size)
    if needs_pad:
        x_in = jnp.pad(x, ((0, B_pad - B), (0, size_pad - size)))
        w_in = jnp.pad(weights, ((0, 0), (0, size_pad - size)))
    else:
        x_in, w_in = x, weights

    grid = (B_pad // tb, size_pad // tf)

    out = pl.pallas_call(
        _eltwise_kernel,
        out_shape=jax.ShapeDtypeStruct((B_pad, size_pad), out_dtype),
        grid_spec=pltpu.PrefetchScalarGridSpec(
            num_scalar_prefetch=0,
            grid=grid,
            in_specs=[
                pl.BlockSpec((tb, tf), lambda i, j: (i, j)),   # x tile per grid step
                pl.BlockSpec((1, tf), lambda i, j: (0, j)),    # weights track feature axis only
            ],
            out_specs=pl.BlockSpec((tb, tf), lambda i, j: (i, j)),
        ),
        compiler_params=pltpu.CompilerParams(
            dimension_semantics=("parallel", "parallel"),
            vmem_limit_bytes=vmem_limit_bytes,
        ),
        input_output_aliases=({0: 0} if donate_x else {}),
    )(x_in, w_in)

    if needs_pad:
        out = out[:B, :size]
    return out


if __name__ == "__main__":
    key = jax.random.PRNGKey(0)

    # --- Test 1: aligned small shapes (single block) ---
    B, size = 8, 128
    kx, kw, kx2, kw2 = jax.random.split(key, 4)
    x = jax.random.normal(kx, (B, size), dtype=jnp.float32)
    # nn.Parameter(torch.Tensor(1, size)) is uninitialized in PyTorch; use a
    # deterministic normal draw instead.
    weights = jax.random.normal(kw, (1, size), dtype=jnp.float32)

    out = trainable_eltwise(x, weights)
    jax.block_until_ready(out)
    assert jnp.allclose(out, x * weights, atol=1e-6, rtol=1e-6)

    # --- Test 2: ragged shapes (exercises padding + multi-step batch grid) ---
    B2, size2 = 300, 200
    x2 = jax.random.normal(kx2, (B2, size2), dtype=jnp.float32)
    w2 = jax.random.normal(kw2, (1, size2), dtype=jnp.float32)

    out2 = trainable_eltwise(x2, w2)
    jax.block_until_ready(out2)
    assert out2.shape == (B2, size2)
    assert jnp.allclose(out2, x2 * w2, atol=1e-6, rtol=1e-6)

    print("KERNEL_OK")
</pallas_src>

<mosaic_0001>
module attributes {stable_mosaic.version = 11 : i64} {
  func.func @_eltwise_kernel(%arg0: i32, %arg1: i32, %arg2: memref<8x128xf32, #tpu.memory_space<vmem>>, %arg3: memref<1x128xf32, #tpu.memory_space<vmem>>, %arg4: memref<8x128xf32, #tpu.memory_space<vmem>>) attributes {dimension_semantics = [#tpu.dimension_semantics<parallel>, #tpu.dimension_semantics<parallel>], iteration_bounds = array<i64: 1, 1>, scalar_prefetch = 0 : i64, scratch_operands = 0 : i64, tpu.core_type = #tpu.core_type<tc>, window_params = [{transform_indices = @transform_0, window_bounds = array<i64: 8, 128>}, {transform_indices = @transform_1, window_bounds = array<i64: 1, 128>}, {transform_indices = @transform_2, window_bounds = array<i64: 8, 128>}]} {
    %c0 = arith.constant 0 : index
    %c0_0 = arith.constant 0 : index
    %0 = vector.load %arg2[%c0, %c0_0] : memref<8x128xf32, #tpu.memory_space<vmem>>, vector<8x128xf32>
    %c0_1 = arith.constant 0 : index
    %c0_2 = arith.constant 0 : index
    %1 = vector.load %arg3[%c0_1, %c0_2] : memref<1x128xf32, #tpu.memory_space<vmem>>, vector<1x128xf32>
    %2 = vector.broadcast %1 : vector<1x128xf32> to vector<8x128xf32>
    %3 = arith.mulf %0, %2 : vector<8x128xf32>
    %c0_3 = arith.constant 0 : index
    %c0_4 = arith.constant 0 : index
    %4 = vector.load %arg4[%c0_3, %c0_4] : memref<8x128xf32, #tpu.memory_space<vmem>>, vector<8x128xf32>
    tpu.vector_store %arg4[%c0_3, %c0_4], %3 {strides = array<i32>} : memref<8x128xf32, #tpu.memory_space<vmem>>, vector<8x128xf32>,
    return
  }
  func.func @transform_0(%arg0: i32, %arg1: i32) -> (i32, i32) {
    %c0_i32 = arith.constant 0 : i32
    return %arg0, %arg1 : i32, i32
  }
  func.func @transform_1(%arg0: i32, %arg1: i32) -> (i32, i32) {
    %c0_i32 = arith.constant 0 : i32
    %c0_i32_0 = arith.constant 0 : i32
    return %c0_i32, %arg1 : i32, i32
  }
  func.func @transform_2(%arg0: i32, %arg1: i32) -> (i32, i32) {
    %c0_i32 = arith.constant 0 : i32
    return %arg0, %arg1 : i32, i32
  }
}

</mosaic_0001>

<bundles_post_ra>
// kernel: tpu_custom_call.1
= control target key start
LH: loop header
LB: loop body
LE: loop exit
PB: predicated region body
PF: predicated region fallthrough
CT: control target
= control target key end

     0   :  { %7 = vsyncpa [#allocation3], 0  ;;  %s144_s0 = inlined_call_operand.hbm [shape: f32[8,128], index: 0, kind: input, shape index: {}]   ;;  %s145_s1 = inlined_call_operand.vmem [shape: f32[1,128], index: 1, kind: input, shape index: {}]   ;;  %s146_s2 = inlined_call_operand.hbm [shape: f32[8,128], index: 2, kind: output, shape index: {}]  }
   0x1   :  { %8 = vsyncpa [#allocation4], 0  ;;  %s100_s9 = smov [#allocation2]   ;;  %s52_s13 = scalar_lea.hbm %s144_s0, 128 }
   0x2   :  { %s15_s10 = sshll.u32 %s100_s9, 4  ;;  %p53_p0 = scmp.ne.s32.totalorder %s144_s0, %s52_s13  ;;  %s16_s10 = int_to_ptr.vmem [resolvable:$true] %s15_s10 }
   0x3   :  { %p56_p1 = scmp.lt.u32.totalorder %s52_s13, %s144_s0 }
   0x5   :  { %p58_p2 = pnand %p56_p1, %p53_p0 }
   0x7   :  { %61 = shalt.err (!%p58_p2)
}
   0x8   :  { %s62_s18 = scalar_lea.vmem %s16_s10, 128  ;;  %p67_p4 = scmp.lt.s32.totalorder %s16_s10, %s16_s10 }
   0x9   :  { %p63_p3 = scmp.ne.s32.totalorder %s16_s10, %s62_s18  ;;  %p68_p5 = scmp.lt.s32.totalorder %s62_s18, %s62_s18 }
   0xb   :  { %p69_p6 = por %p68_p5, %p67_p4 }
   0xd   :  { %p70_p7 = pnand %p69_p6, %p63_p3 }
   0xf   :  { %73 = shalt.err (!%p70_p7)
}
  0x10   :  { %18 = dma.hbm_to_vmem [thread:$0]  %s144_s0, 128, %s16_s10, [#allocation3]  }
  0x11   :  { %96 = dma.done.wait [#allocation3], 128  }
  0x12   :  { %97 = vsyncadd [#allocation3], 4294967168  ;;  %s101_s21 = smov [#allocation5]   ;;  %v24_v0 = vld [vmem:[#allocation2] sm:$0xff] }
  0x13   :  { %s40_s22 = sshll.u32 %s101_s21, 4  ;;  %v49_v1 = vld [vmem:[%s145_s1] ss:$0 sm:$0xff]  ;;  %s41_s22 = int_to_ptr.vmem [resolvable:$true] %s40_s22 }
  0x14   :  { %v32_v2 = vmul.f32 %v49_v1, %v24_v0  ;;  %s74_s25 = scalar_lea.vmem %s41_s22, 128  ;;  %p79_p9 = scmp.lt.s32.totalorder %s41_s22, %s41_s22 }
  0x15   :  { %p75_p8 = scmp.ne.s32.totalorder %s41_s22, %s74_s25  ;;  %p80_p10 = scmp.lt.s32.totalorder %s74_s25, %s74_s25 }
  0x16   :  { %33 = vst [vmem:[#allocation5] sm:$0xff] %v32_v2 }
  0x17   :  { %p81_p11 = por %p80_p10, %p79_p9 }
  0x19   :  { %p82_p12 = pnand %p81_p11, %p75_p8 }
  0x1b   :  { %85 = shalt.err (!%p82_p12)
}
  0x1c   :  { %s86_s27 = scalar_lea.hbm %s146_s2, 128 }
  0x1d   :  { %p87_p13 = scmp.ne.s32.totalorder %s146_s2, %s86_s27  ;;  %p90_p0 = scmp.lt.u32.totalorder %s86_s27, %s146_s2 }
  0x1f   :  { %p92_p1 = pnand %p90_p0, %p87_p13 }
  0x21   :  { %95 = shalt.err (!%p92_p1)
}
  0x22   :  { %43 = dma.vmem_to_hbm [thread:$0]  %s41_s22, 128, %s146_s2, [#allocation4]  }
  0x23   :  { %98 = dma.done.wait [#allocation4], 128  }
  0x24   :  { %99 = vsyncadd [#allocation4], 4294967168 }
  0x25   :  { %47 = vsyncpa [#allocation3], 1 }
  0x26   :  { %48 = vsyncpa [#allocation4], 1 }

</bundles_post_ra>
